<compile_context>
chip_gen: v5e
topology: v5e:2x2
jax: 0.10.0
libtpu: 0.0.40
codegen_flags: <defaults>
</compile_context>

<pallas_src>
import functools

import jax
import jax.numpy as jnp
from jax.experimental import pallas as pl
from jax.experimental.pallas import tpu as pltpu


LANE = 128  # TPU lane width; hidden/output dims are zero-padded to multiples of this.


def _round_up(v, m):
    return ((v + m - 1) // m) * m


_ACTIVATIONS = {
    "relu":    lambda h: jnp.maximum(h, 0.0),
    "tanh":    jnp.tanh,
    "sigmoid": jax.nn.sigmoid,
    "leaky":   jax.nn.leaky_relu,   # torch default negative_slope=0.01 matches
    "elu":     jax.nn.elu,          # torch default alpha=1.0 matches
    "relu6":   lambda h: jnp.clip(h, 0.0, 6.0),
}

# EUP-bound on v5e (no bf16 EUP, single unit): tanh / sigmoid / elu.
_EUP_ACTIVATIONS = ("tanh", "sigmoid", "elu")


def _make_mlp_kernel(num_hidden, activation, out_rows):
    """Fused MLP kernel: num_hidden (Linear+act) layers + transposed output head."""
    act = _ACTIVATIONS[activation]

    def kernel(*refs):
        x_ref = refs[0]
        out_ref = refs[-1]
        wb = refs[1:-1]                       # (w0, b0, w1, b1, ..., w_last, b_last)

        # In-kernel bf16 cast: x is read from HBM once, in f32, and narrowed here.
        h = x_ref[...].astype(jnp.bfloat16)

        for li in range(num_hidden):
            w_ref = wb[2 * li]                # (in_pad, out_pad) bf16
            b_ref = wb[2 * li + 1]            # (1, out_pad) f32
            # bf16 x bf16 -> f32 accumulation on the MXU; bias/activation in f32 on the VPU.
            h = jnp.dot(h, w_ref[...], preferred_element_type=jnp.float32) + b_ref[...]
            # Dropout(p=0.0) is the identity.
            h = act(h).astype(jnp.bfloat16)   # back to bf16 for the next MXU pass

        # Output head computed already-transposed: (out_pad, bm) = W_last (out_pad, hid) . h^T
        # (dot_general contracting both hidden dims -> no XLU transpose, lane-dense store).
        w_ref = wb[-2]                        # (out_pad, hid_pad) bf16  (PyTorch layout)
        b_ref = wb[-1]                        # (out_pad, 1) f32
        y_t = jax.lax.dot_general(
            w_ref[...], h, (((1,), (1,)), ((), ())),
            preferred_element_type=jnp.float32)
        y_t = y_t + b_ref[...]                # bias broadcast over lanes
        out_ref[...] = y_t[:out_rows, :].astype(out_ref.dtype)

    return kernel


def init_mlp_params(key, feature_dim, hidsizes, outputs):
    """PyTorch-Linear-style init U(-1/sqrt(fan_in), 1/sqrt(fan_in)) on the *real* dims, then
    zero-padded so hidden/output dims are multiples of 128 (lane-dense tiles).

    Hidden layers are stored (in_pad, out_pad) bf16 with bias (1, out_pad) f32.
    The output head is stored (out_pad, in_pad) bf16 (PyTorch nn.Linear layout) with bias
    (out_pad, 1) f32 so the kernel can emit a transposed, lane-dense result.
    Zero padding keeps padded lanes mathematically inert for any activation."""
    dims = [feature_dim] + list(hidsizes)
    pad = lambda v: _round_up(v, LANE)

    params = []
    for i in range(len(hidsizes)):
        fan_in, fan_out = dims[i], dims[i + 1]
        in_p = fan_in if i == 0 else pad(fan_in)   # feature_dim deliberately left unpadded
        out_p = pad(fan_out)
        key, kw, kb = jax.random.split(key, 3)
        bound = 1.0 / float(fan_in) ** 0.5
        w = jax.random.uniform(kw, (fan_in, fan_out), jnp.float32, -bound, bound)
        b = jax.random.uniform(kb, (1, fan_out), jnp.float32, -bound, bound)
        w = jnp.pad(w, ((0, in_p - fan_in), (0, out_p - fan_out)))
        b = jnp.pad(b, ((0, 0), (0, out_p - fan_out)))
        params.append((w.astype(jnp.bfloat16), b))

    # Output head (transposed storage).
    fan_in = hidsizes[-1]
    in_p, out_p = pad(fan_in), pad(outputs)
    key, kw, kb = jax.random.split(key, 3)
    bound = 1.0 / float(fan_in) ** 0.5
    w = jax.random.uniform(kw, (outputs, fan_in), jnp.float32, -bound, bound)
    b = jax.random.uniform(kb, (outputs, 1), jnp.float32, -bound, bound)
    w = jnp.pad(w, ((0, out_p - outputs), (0, in_p - fan_in)))
    b = jnp.pad(b, ((0, out_p - outputs), (0, 0)))
    params.append((w.astype(jnp.bfloat16), b))
    return params


def _choose_block_m(n, block_m):
    # Tiny batches: one tile (grid=(1,)), rounded up to the f32 sublane multiple.
    if n <= 256:
        return _round_up(max(n, 1), 8)
    # Large batches: MXU-wide tiles (multiple of 256), capped near n/2 so the grid always has
    # >= 2 steps and both v7x TensorCores get work.
    bm = min(_round_up(block_m, 256), _round_up(n, 256))
    half = _round_up((n + 1) // 2, 256)
    return max(256, min(bm, half))


@functools.partial(jax.jit, static_argnames=("outputs", "activation", "block_m"))
def mlp_forward(x, params, outputs=1, activation="relu", block_m=512):
    """Returns (None, y) matching MLP.forward (y = mlp(x).squeeze(-1))."""
    if x.ndim < 2:
        x = x[None, :]
    lead_shape = x.shape[:-1]
    x2 = x.reshape(-1, x.shape[-1])
    n, d = x2.shape

    bm = _choose_block_m(n, block_m)
    n_pad = _round_up(n, bm)
    if n_pad != n:
        x2 = jnp.pad(x2, ((0, n_pad - n), (0, 0)))

    flat = [t for wb in params for t in wb]
    num_hidden = len(params) - 1
    grid = (n_pad // bm,)

    # x tiled along batch (f32, cast to bf16 in-kernel); all weights/biases are full blocks
    # with constant index_maps, so they are fetched once and stay resident in VMEM.
    in_specs = [pl.BlockSpec((bm, d), lambda i: (i, 0))]
    for w, b in params:
        # TODO(synk): for very wide layers on v7x (64 MiB VMEM), single-buffer these constant
        # blocks (pipeline_mode=pl.Buffered(1)) to halve their resident footprint.
        in_specs.append(pl.BlockSpec(w.shape, lambda i: (0, 0)))
        in_specs.append(pl.BlockSpec(b.shape, lambda i: (0, 0)))

    # Transposed, lane-dense output: (outputs, n_pad); each grid step stores (outputs, bm).
    out_shape = jax.ShapeDtypeStruct((outputs, n_pad), jnp.float32)
    out_spec = pl.BlockSpec((outputs, bm), lambda i: (0, i))

    # Advisory cost estimate + VMEM budget computed from actual buffer sizes.
    param_bytes = sum(t.size * t.dtype.itemsize for t in flat)
    flops = 2 * n_pad * sum(int(w.shape[0]) * int(w.shape[1]) for w, _ in params)
    hidden_elems = n_pad * sum(int(w.shape[1]) for w, _ in params[:-1])
    transcendentals = hidden_elems if activation in _EUP_ACTIVATIONS else 0
    bytes_accessed = n_pad * d * 4 + param_bytes + outputs * n_pad * 4
    cost = pl.CostEstimate(flops=flops, transcendentals=transcendentals,
                           bytes_accessed=bytes_accessed)

    max_width = max(max(int(w.shape[0]), int(w.shape[1])) for w, _ in params)
    vmem_need = (2 * bm * d * 4                 # x tile, double-buffered
                 + 2 * outputs * bm * 4         # output tile, double-buffered
                 + 2 * param_bytes              # resident weights/biases (double-buffered)
                 + 4 * bm * max_width * 4)      # live f32/bf16 intermediates (with slack)
    vmem_limit = int(min(48 * 1024 * 1024, max(2 * vmem_need, 32 * 1024 * 1024)))

    out = pl.pallas_call(
        _make_mlp_kernel(num_hidden, activation, outputs),
        out_shape=out_shape,
        grid=grid,
        in_specs=in_specs,
        out_specs=out_spec,
        cost_estimate=cost,
        compiler_params=pltpu.CompilerParams(
            dimension_semantics=("parallel",),   # batch tiles shard across TCs (v7x)
            vmem_limit_bytes=vmem_limit,         # conservative for v7x's 64 MiB physical VMEM;
        ),                                       # v5e/v6e (128 MiB) could raise toward ~96 MiB
    )(x2, *flat)

    if outputs == 1:                             # .squeeze(-1) of the 1-wide head
        y = out[0, :n].reshape(lead_shape)
    else:
        y = out[:, :n].T.reshape(lead_shape + (outputs,))
    return None, y


def _reference_forward(x, params, outputs=1, activation="relu"):
    """Plain-JAX reference with matched (bf16 matmul, f32 accumulate) numerics."""
    act = _ACTIVATIONS[activation]
    if x.ndim < 2:
        x = x[None, :]
    lead_shape = x.shape[:-1]
    h = x.reshape(-1, x.shape[-1]).astype(jnp.bfloat16)
    for w, b in params[:-1]:
        h = jnp.dot(h, w, preferred_element_type=jnp.float32) + b
        h = act(h).astype(jnp.bfloat16)
    w, b = params[-1]                             # (out_pad, hid_pad), (out_pad, 1)
    y = jnp.dot(h, w.T, preferred_element_type=jnp.float32) + b[:, 0][None, :]
    y = y[:, :outputs].reshape(lead_shape + (outputs,))
    return jnp.squeeze(y, axis=-1) if outputs == 1 else y


if __name__ == "__main__":
    # Small shapes consistent with the module (MLP over feature vectors).
    batch = 8
    feature_dim = 16
    hidsizes = [64, 32, 32]   # scaled-down analogue of the default [1024, 512, 32]
    outputs = 1

    key = jax.random.PRNGKey(0)
    key_x, key_p = jax.random.split(key)
    x = jax.random.normal(key_x, (batch, feature_dim), jnp.float32)
    params = init_mlp_params(key_p, feature_dim, hidsizes, outputs)

    none_out, y = mlp_forward(x, params, outputs=outputs, activation="relu")
    y = jax.block_until_ready(y)

    y_ref = _reference_forward(x, params, outputs=outputs, activation="relu")
    assert none_out is None
    assert y.shape == (batch,), y.shape
    assert jnp.allclose(y, y_ref, atol=1e-3, rtol=1e-3), (y, y_ref)

    print("KERNEL_OK")
</pallas_src>

<mosaic_0001>
module attributes {stable_mosaic.version = 11 : i64} {
  func.func @kernel(%arg0: i32, %arg1: memref<8x16xf32, #tpu.memory_space<vmem>>, %arg2: memref<16x128xbf16, #tpu.memory_space<vmem>>, %arg3: memref<1x128xf32, #tpu.memory_space<vmem>>, %arg4: memref<128x128xbf16, #tpu.memory_space<vmem>>, %arg5: memref<1x128xf32, #tpu.memory_space<vmem>>, %arg6: memref<128x128xbf16, #tpu.memory_space<vmem>>, %arg7: memref<1x128xf32, #tpu.memory_space<vmem>>, %arg8: memref<128x128xbf16, #tpu.memory_space<vmem>>, %arg9: memref<128x1xf32, #tpu.memory_space<vmem>>, %arg10: memref<1x8xf32, #tpu.memory_space<vmem>>) attributes {dimension_semantics = [#tpu.dimension_semantics<parallel>], iteration_bounds = array<i64: 1>, scalar_prefetch = 0 : i64, scratch_operands = 0 : i64, tpu.core_type = #tpu.core_type<tc>, window_params = [{transform_indices = @transform_0, window_bounds = array<i64: 8, 16>}, {pipeline_mode = #tpu.pipeline_mode<synchronous>, transform_indices = @transform_1, window_bounds = array<i64: 16, 128>}, {pipeline_mode = #tpu.pipeline_mode<synchronous>, transform_indices = @transform_2, window_bounds = array<i64: 1, 128>}, {pipeline_mode = #tpu.pipeline_mode<synchronous>, transform_indices = @transform_3, window_bounds = array<i64: 128, 128>}, {pipeline_mode = #tpu.pipeline_mode<synchronous>, transform_indices = @transform_4, window_bounds = array<i64: 1, 128>}, {pipeline_mode = #tpu.pipeline_mode<synchronous>, transform_indices = @transform_5, window_bounds = array<i64: 128, 128>}, {pipeline_mode = #tpu.pipeline_mode<synchronous>, transform_indices = @transform_6, window_bounds = array<i64: 1, 128>}, {pipeline_mode = #tpu.pipeline_mode<synchronous>, transform_indices = @transform_7, window_bounds = array<i64: 128, 128>}, {pipeline_mode = #tpu.pipeline_mode<synchronous>, transform_indices = @transform_8, window_bounds = array<i64: 128, 1>}, {transform_indices = @transform_9, window_bounds = array<i64: 1, 8>}]} {
    %c0 = arith.constant 0 : index
    %c0_0 = arith.constant 0 : index
    %0 = vector.load %arg1[%c0, %c0_0] : memref<8x16xf32, #tpu.memory_space<vmem>>, vector<8x16xf32>
    %1 = arith.truncf %0 : vector<8x16xf32> to vector<8x16xbf16>
    %c0_1 = arith.constant 0 : index
    %c0_2 = arith.constant 0 : index
    %2 = vector.load %arg2[%c0_1, %c0_2] : memref<16x128xbf16, #tpu.memory_space<vmem>>, vector<16x128xbf16>
    %cst = arith.constant dense<0.000000e+00> : vector<8x128xf32>
    %3 = tpu.matmul %1, %2, %cst {dimension_numbers = #tpu.dot_dimension_numbers<[1], [0], [0], [1], [0, 0, 1, 1], [], []>} : vector<8x16xbf16>, vector<16x128xbf16>, vector<8x128xf32> -> vector<8x128xf32>
    %c0_3 = arith.constant 0 : index
    %c0_4 = arith.constant 0 : index
    %4 = vector.load %arg3[%c0_3, %c0_4] : memref<1x128xf32, #tpu.memory_space<vmem>>, vector<1x128xf32>
    %5 = vector.broadcast %4 : vector<1x128xf32> to vector<8x128xf32>
    %6 = arith.addf %3, %5 : vector<8x128xf32>
    %cst_5 = arith.constant 0.000000e+00 : f32
    %7 = vector.broadcast %cst_5 : f32 to vector<8x128xf32>
    %8 = arith.maximumf %6, %7 : vector<8x128xf32>
    %9 = arith.truncf %8 : vector<8x128xf32> to vector<8x128xbf16>
    %c0_6 = arith.constant 0 : index
    %c0_7 = arith.constant 0 : index
    %10 = vector.load %arg4[%c0_6, %c0_7] : memref<128x128xbf16, #tpu.memory_space<vmem>>, vector<128x128xbf16>
    %cst_8 = arith.constant dense<0.000000e+00> : vector<8x128xf32>
    %11 = tpu.matmul %9, %10, %cst_8 {dimension_numbers = #tpu.dot_dimension_numbers<[1], [0], [0], [1], [0, 0, 1, 1], [], []>} : vector<8x128xbf16>, vector<128x128xbf16>, vector<8x128xf32> -> vector<8x128xf32>
    %c0_9 = arith.constant 0 : index
    %c0_10 = arith.constant 0 : index
    %12 = vector.load %arg5[%c0_9, %c0_10] : memref<1x128xf32, #tpu.memory_space<vmem>>, vector<1x128xf32>
    %13 = vector.broadcast %12 : vector<1x128xf32> to vector<8x128xf32>
    %14 = arith.addf %11, %13 : vector<8x128xf32>
    %cst_11 = arith.constant 0.000000e+00 : f32
    %15 = vector.broadcast %cst_11 : f32 to vector<8x128xf32>
    %16 = arith.maximumf %14, %15 : vector<8x128xf32>
    %17 = arith.truncf %16 : vector<8x128xf32> to vector<8x128xbf16>
    %c0_12 = arith.constant 0 : index
    %c0_13 = arith.constant 0 : index
    %18 = vector.load %arg6[%c0_12, %c0_13] : memref<128x128xbf16, #tpu.memory_space<vmem>>, vector<128x128xbf16>
    %cst_14 = arith.constant dense<0.000000e+00> : vector<8x128xf32>
    %19 = tpu.matmul %17, %18, %cst_14 {dimension_numbers = #tpu.dot_dimension_numbers<[1], [0], [0], [1], [0, 0, 1, 1], [], []>} : vector<8x128xbf16>, vector<128x128xbf16>, vector<8x128xf32> -> vector<8x128xf32>
    %c0_15 = arith.constant 0 : index
    %c0_16 = arith.constant 0 : index
    %20 = vector.load %arg7[%c0_15, %c0_16] : memref<1x128xf32, #tpu.memory_space<vmem>>, vector<1x128xf32>
    %21 = vector.broadcast %20 : vector<1x128xf32> to vector<8x128xf32>
    %22 = arith.addf %19, %21 : vector<8x128xf32>
    %cst_17 = arith.constant 0.000000e+00 : f32
    %23 = vector.broadcast %cst_17 : f32 to vector<8x128xf32>
    %24 = arith.maximumf %22, %23 : vector<8x128xf32>
    %25 = arith.truncf %24 : vector<8x128xf32> to vector<8x128xbf16>
    %c0_18 = arith.constant 0 : index
    %c0_19 = arith.constant 0 : index
    %26 = vector.load %arg8[%c0_18, %c0_19] : memref<128x128xbf16, #tpu.memory_space<vmem>>, vector<128x128xbf16>
    %cst_20 = arith.constant dense<0.000000e+00> : vector<128x8xf32>
    %27 = tpu.matmul %26, %25, %cst_20 {dimension_numbers = #tpu.dot_dimension_numbers<[1], [1], [0], [0], [0, 0, 1, 0], [], []>} : vector<128x128xbf16>, vector<8x128xbf16>, vector<128x8xf32> -> vector<128x8xf32>
    %c0_21 = arith.constant 0 : index
    %c0_22 = arith.constant 0 : index
    %28 = vector.load %arg9[%c0_21, %c0_22] : memref<128x1xf32, #tpu.memory_space<vmem>>, vector<128x1xf32>
    %29 = vector.broadcast %28 : vector<128x1xf32> to vector<128x8xf32>
    %30 = arith.addf %27, %29 : vector<128x8xf32>
    %31 = vector.extract_strided_slice %30 {offsets = [0, 0], sizes = [1, 8], strides = [1, 1]} : vector<128x8xf32> to vector<1x8xf32>
    %c0_23 = arith.constant 0 : index
    %c0_24 = arith.constant 0 : index
    %32 = vector.load %arg10[%c0_23, %c0_24] : memref<1x8xf32, #tpu.memory_space<vmem>>, vector<1x8xf32>
    tpu.vector_store %arg10[%c0_23, %c0_24], %31 {strides = array<i32>} : memref<1x8xf32, #tpu.memory_space<vmem>>, vector<1x8xf32>,
    return
  }
  func.func @transform_0(%arg0: i32) -> (i32, i32) {
    %c0_i32 = arith.constant 0 : i32
    %c0_i32_0 = arith.constant 0 : i32
    return %arg0, %c0_i32 : i32, i32
  }
  func.func @transform_1(%arg0: i32) -> (i32, i32) {
    %c0_i32 = arith.constant 0 : i32
    %c0_i32_0 = arith.constant 0 : i32
    %c0_i32_1 = arith.constant 0 : i32
    return %c0_i32, %c0_i32_0 : i32, i32
  }
  func.func @transform_2(%arg0: i32) -> (i32, i32) {
    %c0_i32 = arith.constant 0 : i32
    %c0_i32_0 = arith.constant 0 : i32
    %c0_i32_1 = arith.constant 0 : i32
    return %c0_i32, %c0_i32_0 : i32, i32
  }
  func.func @transform_3(%arg0: i32) -> (i32, i32) {
    %c0_i32 = arith.constant 0 : i32
    %c0_i32_0 = arith.constant 0 : i32
    %c0_i32_1 = arith.constant 0 : i32
    return %c0_i32, %c0_i32_0 : i32, i32
  }
  func.func @transform_4(%arg0: i32) -> (i32, i32) {
    %c0_i32 = arith.constant 0 : i32
    %c0_i32_0 = arith.constant 0 : i32
    %c0_i32_1 = arith.constant 0 : i32
    return %c0_i32, %c0_i32_0 : i32, i32
  }
  func.func @transform_5(%arg0: i32) -> (i32, i32) {
    %c0_i32 = arith.constant 0 : i32
    %c0_i32_0 = arith.constant 0 : i32
    %c0_i32_1 = arith.constant 0 : i32
    return %c0_i32, %c0_i32_0 : i32, i32
  }
  func.func @transform_6(%arg0: i32) -> (i32, i32) {
    %c0_i32 = arith.constant 0 : i32
    %c0_i32_0 = arith.constant 0 : i32
    %c0_i32_1 = arith.constant 0 : i32
    return %c0_i32, %c0_i32_0 : i32, i32
  }
  func.func @transform_7(%arg0: i32) -> (i32, i32) {
    %c0_i32 = arith.constant 0 : i32
    %c0_i32_0 = arith.constant 0 : i32
    %c0_i32_1 = arith.constant 0 : i32
    return %c0_i32, %c0_i32_0 : i32, i32
  }
  func.func @transform_8(%arg0: i32) -> (i32, i32) {
    %c0_i32 = arith.constant 0 : i32
    %c0_i32_0 = arith.constant 0 : i32
    %c0_i32_1 = arith.constant 0 : i32
    return %c0_i32, %c0_i32_0 : i32, i32
  }
  func.func @transform_9(%arg0: i32) -> (i32, i32) {
    %c0_i32 = arith.constant 0 : i32
    %c0_i32_0 = arith.constant 0 : i32
    return %c0_i32, %arg0 : i32, i32
  }
}

</mosaic_0001>

<bundles_post_ra>
// kernel: mlp_forward.1
= control target key start
LH: loop header
LB: loop body
LE: loop exit
PB: predicated region body
PF: predicated region fallthrough
CT: control target
= control target key end

     0   :  { %14 = vsyncpa [#allocation3], 0  ;;  %s847_s0 = inlined_call_operand.hbm [shape: f32[8,16], index: 0, kind: input, shape index: {}]   ;;  %s848_s1 = inlined_call_operand.hbm [shape: bf16[16,128], index: 1, kind: input, shape index: {}]   ;;  %s849_s2 = inlined_call_operand.vmem [shape: f32[1,128], index: 2, kind: input, shape index: {}]   ;;  %s850_s3 = inlined_call_operand.vmem [shape: bf16[128,128], index: 3, kind: input, shape index: {}]   ;;  %s851_s4 = inlined_call_operand.vmem [shape: f32[1,128], index: 4, kind: input, shape index: {}]   ;;  %s852_s5 = inlined_call_operand.vmem [shape: bf16[128,128], index: 5, kind: input, shape index: {}]   ;;  %s853_s6 = inlined_call_operand.vmem [shape: f32[1,128], index: 6, kind: input, shape index: {}]   ;;  %s854_s7 = inlined_call_operand.hbm [shape: bf16[128,128], index: 7, kind: input, shape index: {}]   ;;  %s855_s8 = inlined_call_operand.vmem [shape: f32[128,1], index: 8, kind: input, shape index: {}]   ;;  %s856_s9 = inlined_call_operand.hbm [shape: f32[1,8], index: 9, kind: output, shape index: {}]  }
   0x1   :  { %15 = vsyncpa [#allocation6], 0  ;;  %s32_s11 = sshll.u32 %s848_s1, 4  ;;  %s33_s11 = int_to_ptr.hbm [resolvable:$true] %s32_s11 }
   0x2   :  { %16 = vsyncpa [#allocation4], 0  ;;  %s718_s12 = smov [#allocation5]   ;;  %s22_s16 = sshll.u32 %s847_s0, 4  ;;  %s23_s16 = int_to_ptr.hbm [resolvable:$true] %s22_s16 }
   0x3   :  { %s34_s13 = sshll.u32 %s718_s12, 4  ;;  %s719_s17 = smov 64   ;;  %s35_s13 = int_to_ptr.vmem [resolvable:$true] %s34_s13 }
   0x4   :  { %s720_s18 = smov 4   ;;  %s721_s19 = smov [#allocation2]  }
   0x5   :  { %40 = dma.hbm_to_vmem [thread:$0]  %s33_s11, 128, %s35_s13, [#allocation6], %s719_s17, %s719_s17, %s720_s18  }
   0x6   :  { %s24_s20 = sshll.u32 %s721_s19, 4  ;;  %s55_s23 = sshll.u32 %s854_s7, 4  ;;  %s25_s20 = int_to_ptr.vmem [resolvable:$true] %s24_s20  ;;  %s56_s23 = int_to_ptr.hbm [resolvable:$true] %s55_s23 }
   0x7   :  { %27 = dma.hbm_to_vmem [thread:$0]  %s23_s16, 128, %s25_s20, [#allocation3]  }
   0x8   :  { %s722_s1 = smov [#allocation7]  }
   0x9   :  { %s57_s24 = sshll.u32 %s722_s1, 4  ;;  %s58_s24 = int_to_ptr.vmem [resolvable:$true] %s57_s24 }
   0xa   :  { %63 = dma.hbm_to_vmem [thread:$0]  %s56_s23, 1024, %s58_s24, [#allocation6], %s719_s17, %s719_s17, %s720_s18  }
   0xb   :  { %712 = dma.done.wait [#allocation3], 128  }
   0xc   :  { %713 = vsyncadd [#allocation3], 4294967168 }
   0xd   :  { %714 = dma.done.wait [#allocation6], 1152  }
   0xe   :  { %715 = vsyncadd [#allocation6], 4294966144  ;;  %v578_v0 = vld [vmem:[#allocation5] sm:$0xff]  ;;  %v79_v1 = vld [vmem:[#allocation2] sm:$0xff]  ;;  %vm93_vm0 = vcmask 130048   ;;  %v723_v33 = vmov 0  }
   0xf   :  { %v586_v2 = vld [vmem:[%s850_s3 + $0x38] sm:$0xff]  ;;  %v80_v3 = vpack.c.bf16 %v79_v1, %v79_v1  ;;  %104 = vmatpush.bf16.msra.mxu0 %v578_v0  ;;  %v585_v4 = vld [vmem:[%s850_s3 + $0x30] sm:$0xff]  ;;  %v584_v5 = vld [vmem:[%s850_s3 + $0x28] sm:$0xff]  ;;  %612 = vset.pattern.permute.xlu0 %v723_v33  ;;  %vm457_vm1 = vcmask 57344  }
  0x10   :  { %180 = vmatpush.bf16.msra.mxu1 %v586_v2  ;;  %v583_v6 = vld [vmem:[%s850_s3 + $0x20] sm:$0xff]  ;;  %v582_v7 = vld [vmem:[%s850_s3 + $0x18] sm:$0xff]  ;;  %v581_v8 = vld [vmem:[%s850_s3 + $0x10] sm:$0xff] }
  0x11   :  { %v580_v9 = vld [vmem:[%s850_s3 + $0x8] sm:$0xff]  ;;  %v579_v10 = vld [vmem:[%s850_s3] sm:$0xff]  ;;  %v594_v11 = vld [vmem:[%s852_s5 + $0x38] sm:$0xff] }
  0x12   :  { %481 = vmatmul.msk.bf16.vlgmr.msra.gmra.mxu0 %vm93_vm0, %v80_v3  ;;  %263 = vmatpush.bf16.msra.mxu2 %v594_v11  ;;  %v593_v12 = vld [vmem:[%s852_s5 + $0x30] sm:$0xff]  ;;  %v592_v13 = vld [vmem:[%s852_s5 + $0x28] sm:$0xff]  ;;  %v591_v14 = vld [vmem:[%s852_s5 + $0x20] sm:$0xff] }
  0x13   :  { %v590_v15 = vld [vmem:[%s852_s5 + $0x18] sm:$0xff]  ;;  %v589_v16 = vld [vmem:[%s852_s5 + $0x10] sm:$0xff]  ;;  %v613_v17 = vld [vmem:[%s849_s2] ss:$0 sm:$0xff] }
  0x14   :  { %181 = vmatpush.bf16.msra.mxu1 %v585_v4  ;;  %v588_v23 = vld [vmem:[%s852_s5 + $0x8] sm:$0xff]  ;;  %v587_v24 = vld [vmem:[%s852_s5] sm:$0xff]  ;;  %v595_v38 = vld [vmem:[#allocation7] sm:$0xff] }
  0x15   :  { %v614_v25 = vld [vmem:[%s851_s4] ss:$0 sm:$0xff]  ;;  %v599_v39 = vld [vmem:[#allocation7 + $0x20] sm:$0xff]  ;;  %v598_v41 = vld [vmem:[#allocation7 + $0x18] sm:$0xff] }
  0x16   :  { %264 = vmatpush.bf16.msra.mxu2 %v593_v12  ;;  %v615_v31 = vld [vmem:[%s853_s6] ss:$0 sm:$0xff]  ;;  %v596_v42 = vld [vmem:[#allocation7 + $0x8] sm:$0xff]  ;;  %v602_v46 = vld [vmem:[#allocation7 + $0x38] sm:$0xff]  ;;  %s724_s6 = smov [#allocation8]  }
  0x17   :  { %v294_v40 = vld [vmem:[%s855_s8] sm:$0xff]  ;;  %v600_v43 = vld [vmem:[#allocation7 + $0x28] sm:$0xff]  ;;  %s464_s14 = sshll.u32 %s724_s6, 4  ;;  %s466_s8 = sshll.u32 %s856_s9, 4  ;;  %s465_s14 = int_to_ptr.vmem [resolvable:$true] %s464_s14  ;;  %s467_s8 = int_to_ptr.hbm [resolvable:$true] %s466_s8 }
  0x18   :  { %182 = vmatpush.bf16.msra.mxu1 %v584_v5  ;;  %312 = vperm.xlu0 %612, %v294_v40   ;;  %v597_v44 = vld [vmem:[#allocation7 + $0x10] sm:$0xff] }
  0x19   :  { %v601_v45 = vld [vmem:[#allocation7 + $0x30] sm:$0xff] }
  0x1a   :  { %265 = vmatpush.bf16.msra.mxu2 %v592_v13 }
  0x1c   :  { %183 = vmatpush.bf16.msra.mxu1 %v583_v6 }
  0x1e   :  { %266 = vmatpush.bf16.msra.mxu2 %v591_v14 }
  0x20   :  { %184 = vmatpush.bf16.msra.mxu1 %v582_v7 }
  0x22   :  { %267 = vmatpush.bf16.msra.mxu2 %v590_v15 }
  0x24   :  { %185 = vmatpush.bf16.msra.mxu1 %v581_v8 }
  0x26   :  { %268 = vmatpush.bf16.msra.mxu2 %v589_v16 }
  0x28   :  { %186 = vmatpush.bf16.msra.mxu1 %v580_v9 }
  0x2a   :  { %269 = vmatpush.bf16.msra.mxu2 %v588_v23 }
  0x2c   :  { %187 = vmatpush.bf16.msra.mxu1 %v579_v10 }
  0x2e   :  { %270 = vmatpush.bf16.msra.mxu2 %v587_v24 }
  0x8a   :  { %v313_v47 = vpop.permute.xlu0 %312 }
  0x8f   :  { %v106_v18 = vpop.f32.mrf.mxu0 }
  0x90   :  { %v107_v19 = vadd.f32 %v613_v17, %v106_v18 }
  0x92   :  { %v110_v20 = vmax.f32 %v107_v19, 0.0 }
  0x94   :  { %v111_v21 = vpack.c.bf16 %v110_v20, %v110_v20 }
  0x96   :  { %188 = vmatmul.bf16.vlgmr.msra.gmra.mxu1 %v111_v21 }
  0x97   :  { %v108_v22 = vpop.f32.mrf.mxu0 }
 0x113   :  { %v189_v26 = vpop.f32.mrf.mxu1 }
 0x114   :  { %v190_v27 = vadd.f32 %v614_v25, %v189_v26 }
 0x116   :  { %v193_v28 = vmax.f32 %v190_v27, 0.0 }
 0x118   :  { %v194_v29 = vpack.c.bf16 %v193_v28, %v193_v28 }
 0x11a   :  { %271 = vmatmul.bf16.vlgmr.msra.gmra.mxu2 %v194_v29 }
 0x11b   :  { %v191_v30 = vpop.f32.mrf.mxu1 }
 0x19d   :  { %v272_v32 = vpop.f32.mrf.mxu2 }
 0x19e   :  { %v273_v34 = vadd.f32 %v615_v31, %v272_v32 }
 0x1a0   :  { %v276_v35 = vmax.f32 %v273_v34, 0.0 }
 0x1a2   :  { %v277_v36 = vpack.c.bf16 %v276_v35, %v276_v35 }
 0x1a4   :  { %430 = vmatpush.bf16.xpose.msrb.mxu0 %v277_v36  ;;  %603 = vmatpush.bf16.xpose.msrb.mxu1 %v277_v36 }
 0x1a5   :  { %604 = vmatpush.bf16.xpose.msra.mxu3 %v277_v36  ;;  %v274_v37 = vpop.f32.mrf.mxu2 }
 0x1ab   :  { %431 = vmatmul.bf16.vlgmr.msrb.gmra.mxu0 %v595_v38  ;;  %441 = vmatmul.bf16.vlgmr.msrb.gmra.mxu1 %v598_v41 }
 0x1ac   :  { %444 = vmatmul.bf16.vlgmr.msra.gmra.mxu3 %v599_v39 }
 0x1bb   :  { %435 = vmatmul.bf16.gmra.mxu0 %v596_v42 }
 0x1bc   :  { %447 = vmatmul.bf16.gmra.mxu3 %v600_v43 }
 0x1cb   :  { %438 = vmatmul.bf16.gmra.mxu0 %v597_v44 }
 0x1cc   :  { %450 = vmatmul.bf16.gmra.mxu3 %v601_v45 }
 0x1dc   :  { %453 = vmatmul.bf16.gmra.mxu3 %v602_v46 }
 0x228   :  { %v432_v48 = vpop.f32.mrf.mxu0  ;;  %v442_v50 = vpop.f32.mrf.mxu1 }
 0x229   :  { %v433_v49 = vadd.f32 %v432_v48, %v313_v47 }
 0x22b   :  { %458 = vst.msk [vmem:[#allocation8] sm:$0x1] %vm457_vm1, %v433_v49 }
 0x22c   :  { %469 = dma.vmem_to_hbm [thread:$0]  %s465_s14, 16, %s467_s8, [#allocation4]  }
 0x22f   :  { %v445_v51 = vpop.f32.mrf.mxu3 }
 0x230   :  { %v434_v52 = vpop.f32.mrf.mxu0  ;;  %v443_v53 = vpop.f32.mrf.mxu1 }
 0x237   :  { %v446_v54 = vpop.f32.mrf.mxu3 }
 0x238   :  { %v436_v55 = vpop.f32.mrf.mxu0 }
 0x23f   :  { %v448_v56 = vpop.f32.mrf.mxu3 }
 0x240   :  { %v437_v57 = vpop.f32.mrf.mxu0 }
 0x247   :  { %v449_v58 = vpop.f32.mrf.mxu3 }
 0x248   :  { %v439_v59 = vpop.f32.mrf.mxu0 }
 0x24f   :  { %v451_v60 = vpop.f32.mrf.mxu3 }
 0x250   :  { %v440_v61 = vpop.f32.mrf.mxu0 }
 0x257   :  { %v452_v62 = vpop.f32.mrf.mxu3 }
 0x25f   :  { %v454_v63 = vpop.f32.mrf.mxu3 }
 0x267   :  { %v455_v0 = vpop.f32.mrf.mxu3 }
 0x268   :  { %716 = dma.done.wait [#allocation4], 16  }
 0x269   :  { %717 = vsyncadd [#allocation4], 4294967280 }
 0x26a   :  { %474 = vsyncpa [#allocation3], 1 }
 0x26b   :  { %475 = vsyncpa [#allocation6], 1 }
 0x26c   :  { %476 = vsyncpa [#allocation4], 1 }

</bundles_post_ra>
